<compile_context>
chip_gen: v5e
topology: v5e:2x2
jax: 0.10.0
libtpu: 0.0.40
codegen_flags: <defaults>
</compile_context>

<pallas_src>
import jax
import jax.numpy as jnp
from jax.experimental import pallas as pl
from jax.experimental.pallas import tpu as pltpu

LANE = 128            # feature dims feeding the MXU are padded to this
SUBLANE = 8           # batch / K dims are padded to multiples of this
MIN_PARALLEL_ROWS = 128  # below 2*this, a single batch tile is used


def _round_up(n, m):
    return -(-n // m) * m


def _cdiv(a, b):
    return -(-a // b)


# ---------------------------------------------------------------------------
# Kernel: one fused 3-layer MLP on a (tb, *) batch tile.
# ---------------------------------------------------------------------------
def generator_mlp_kernel(x_ref, w1_ref, b1_ref, w2_ref, b2_ref, w3_ref, b3_ref,
                         out_ref):
    # Layer 1: bf16 operands, f32 MXU accumulation; bias + ReLU in f32.
    x = x_ref[...].astype(jnp.bfloat16)
    h1 = jnp.dot(x, w1_ref[...], preferred_element_type=jnp.float32) + b1_ref[...]
    h1 = jnp.maximum(h1, 0.0).astype(jnp.bfloat16)

    # Layer 2
    h2 = jnp.dot(h1, w2_ref[...], preferred_element_type=jnp.float32) + b2_ref[...]
    h2 = jnp.maximum(h2, 0.0).astype(jnp.bfloat16)

    # Layer 3: narrow (out_dim) output, stored directly (no lane padding).
    y = jnp.dot(h2, w3_ref[...], preferred_element_type=jnp.float32) + b3_ref[...]
    out_ref[...] = y.astype(out_ref.dtype)


# ---------------------------------------------------------------------------
# Parameter preparation (done once, not per call)
# ---------------------------------------------------------------------------
def prepare_kernel_params(params, latent_dim):
    """Zero-pad / cast PyTorch-shaped ([in, out]) params for the fused kernel.

    - w1 stays merged (single K = latent+cond dot; the wrapper does one concat).
    - K dim padded to a sublane multiple; hidden dims padded to 128 lanes.
      Zero padding is exact (padded lanes/rows contribute nothing).
    - Weights stored bf16 (MXU operands); biases stay f32 (added to the f32
      accumulator inside the kernel).
    """
    w1, b1 = params["w1"], params["b1"]
    w2, b2 = params["w2"], params["b2"]
    w3, b3 = params["w3"], params["b3"]

    d_in = w1.shape[0]
    cond_dim = d_in - latent_dim
    h1, h2 = w1.shape[1], w2.shape[1]
    out_dim = w3.shape[1]

    k_pad = _round_up(d_in, SUBLANE)
    h1_pad = _round_up(h1, LANE)
    h2_pad = _round_up(h2, LANE)

    w1p = jnp.pad(w1, ((0, k_pad - d_in), (0, h1_pad - h1))).astype(jnp.bfloat16)
    b1p = jnp.pad(b1, (0, h1_pad - h1)).reshape(1, -1).astype(jnp.float32)

    w2p = jnp.pad(w2, ((0, h1_pad - h1), (0, h2_pad - h2))).astype(jnp.bfloat16)
    b2p = jnp.pad(b2, (0, h2_pad - h2)).reshape(1, -1).astype(jnp.float32)

    w3p = jnp.pad(w3, ((0, h2_pad - h2), (0, 0))).astype(jnp.bfloat16)
    b3p = b3.reshape(1, -1).astype(jnp.float32)

    return {"w1": w1p, "b1": b1p, "w2": w2p, "b2": b2p, "w3": w3p, "b3": b3p,
            "latent_dim": latent_dim, "cond_dim": cond_dim,
            "d_in": d_in, "out_dim": out_dim}


# ---------------------------------------------------------------------------
# Wrapper
# ---------------------------------------------------------------------------
def generator_forward(noise, cond, kparams, *, batch_tile=1024):
    """Pallas-backed forward of the Generator module.

    noise: (B, latent_dim) f32 ; cond: (B, cond_dim) f32
    kparams: output of prepare_kernel_params.
    """
    B = noise.shape[0]
    d_in = kparams["d_in"]
    out_dim = kparams["out_dim"]
    k_pad = kparams["w1"].shape[0]

    # Single concat (fed to one merged-K dot inside the kernel).
    x = jnp.concatenate([noise, cond], axis=1)

    # Tile / grid sizing:
    #  - small B: one full tile rounded to 8 sublanes;
    #  - B >= 2*MIN_PARALLEL_ROWS: at least 2 grid steps so the "parallel"
    #    grid axis can shard across both v7x TensorCores, with tiles up to
    #    batch_tile rows to amortize per-step overhead.
    if B >= 2 * MIN_PARALLEL_ROWS:
        num_tiles = max(2, _cdiv(B, batch_tile))
    else:
        num_tiles = 1
    tb = _round_up(_cdiv(B, num_tiles), SUBLANE)
    B_pad = num_tiles * tb

    if (B_pad != B) or (k_pad != d_in):
        x = jnp.pad(x, ((0, B_pad - B), (0, k_pad - d_in)))

    tiled = lambda cols: pl.BlockSpec((tb, cols), lambda i: (i, 0))
    whole = lambda shape: pl.BlockSpec(shape, lambda i: (0,) * len(shape))

    out = pl.pallas_call(
        generator_mlp_kernel,
        out_shape=jax.ShapeDtypeStruct((B_pad, out_dim), jnp.float32),
        grid=(num_tiles,),
        in_specs=[
            tiled(k_pad),                   # x tile
            whole(kparams["w1"].shape),     # weights: constant index -> fetched once
            whole(kparams["b1"].shape),
            whole(kparams["w2"].shape),
            whole(kparams["b2"].shape),
            whole(kparams["w3"].shape),
            whole(kparams["b3"].shape),
        ],
        out_specs=tiled(out_dim),           # narrow, unpadded output
        compiler_params=pltpu.CompilerParams(dimension_semantics=("parallel",)),
    )(x, kparams["w1"], kparams["b1"], kparams["w2"], kparams["b2"],
      kparams["w3"], kparams["b3"])

    # Only batch padding (if any) is stripped; no lane slice anymore.
    return out if B_pad == B else out[:B]


# ---------------------------------------------------------------------------
# Init + references
# ---------------------------------------------------------------------------
def init_params(key, latent_dim, cond_dim, output_dim):
    """Deterministic init matching nn.Linear shapes (weights stored as [in, out])."""
    d_in = latent_dim + cond_dim
    k = jax.random.split(key, 6)

    def linear(kw, kb, fan_in, fan_out):
        bound = 1.0 / jnp.sqrt(fan_in)
        w = jax.random.uniform(kw, (fan_in, fan_out), jnp.float32, -bound, bound)
        b = jax.random.uniform(kb, (fan_out,), jnp.float32, -bound, bound)
        return w, b

    w1, b1 = linear(k[0], k[1], d_in, 64)
    w2, b2 = linear(k[2], k[3], 64, 128)
    w3, b3 = linear(k[4], k[5], 128, output_dim)
    return {"w1": w1, "b1": b1, "w2": w2, "b2": b2, "w3": w3, "b3": b3}


def reference_forward(noise, cond, params):
    """Pure-JAX f32 reference (mirrors the PyTorch module exactly)."""
    x = jnp.concatenate([noise, cond], axis=1)
    h1 = jnp.maximum(x @ params["w1"] + params["b1"], 0.0)
    h2 = jnp.maximum(h1 @ params["w2"] + params["b2"], 0.0)
    return h2 @ params["w3"] + params["b3"]


def reference_forward_bf16(noise, cond, params):
    """Reference emulating the kernel's numerics (bf16 operands, f32 accum)."""
    bf = jnp.bfloat16
    x = jnp.concatenate([noise, cond], axis=1).astype(bf)
    h1 = jnp.dot(x, params["w1"].astype(bf), preferred_element_type=jnp.float32)
    h1 = jnp.maximum(h1 + params["b1"], 0.0).astype(bf)
    h2 = jnp.dot(h1, params["w2"].astype(bf), preferred_element_type=jnp.float32)
    h2 = jnp.maximum(h2 + params["b2"], 0.0).astype(bf)
    y = jnp.dot(h2, params["w3"].astype(bf), preferred_element_type=jnp.float32)
    return y + params["b3"]


if __name__ == "__main__":
    LATENT_DIM = 10
    COND_DIM = 6
    OUTPUT_DIM = 4
    NUM_AMOSTRAS = 66   # batch size from the original script

    key = jax.random.PRNGKey(0)
    k_noise, k_cond, k_params = jax.random.split(key, 3)

    noise = jax.random.normal(k_noise, (NUM_AMOSTRAS, LATENT_DIM), jnp.float32)
    cond = jax.random.normal(k_cond, (NUM_AMOSTRAS, COND_DIM), jnp.float32)

    params = init_params(k_params, LATENT_DIM, COND_DIM, OUTPUT_DIM)
    kparams = prepare_kernel_params(params, LATENT_DIM)

    # jit the whole forward so the pad / slice / pallas_call are one executable
    # (at B=66 the launch + wrapper ops dominate, not the MLP body).
    fwd = jax.jit(lambda n, c: generator_forward(n, c, kparams))

    out = jax.block_until_ready(fwd(noise, cond))
    assert out.shape == (NUM_AMOSTRAS, OUTPUT_DIM)

    # Tight check vs a bf16-emulated reference (same numeric path as kernel).
    ref16 = reference_forward_bf16(noise, cond, params)
    err16 = float(jnp.max(jnp.abs(out - ref16)))
    assert jnp.allclose(out, ref16, atol=2e-3, rtol=2e-3), err16

    # Loose sanity check vs the exact f32 module semantics.
    ref32 = reference_forward(noise, cond, params)
    err32 = float(jnp.max(jnp.abs(out - ref32)))
    assert jnp.allclose(out, ref32, atol=2.5e-1, rtol=2.5e-1), err32

    print("KERNEL_OK")
</pallas_src>

<mosaic_0001>
module attributes {stable_mosaic.version = 11 : i64} {
  func.func @generator_mlp_kernel(%arg0: i32, %arg1: memref<72x16xf32, #tpu.memory_space<vmem>>, %arg2: memref<16x128xbf16, #tpu.memory_space<vmem>>, %arg3: memref<1x128xf32, #tpu.memory_space<vmem>>, %arg4: memref<128x128xbf16, #tpu.memory_space<vmem>>, %arg5: memref<1x128xf32, #tpu.memory_space<vmem>>, %arg6: memref<128x4xbf16, #tpu.memory_space<vmem>>, %arg7: memref<1x4xf32, #tpu.memory_space<vmem>>, %arg8: memref<72x4xf32, #tpu.memory_space<vmem>>) attributes {dimension_semantics = [#tpu.dimension_semantics<parallel>], iteration_bounds = array<i64: 1>, scalar_prefetch = 0 : i64, scratch_operands = 0 : i64, tpu.core_type = #tpu.core_type<tc>, window_params = [{transform_indices = @transform_0, window_bounds = array<i64: 72, 16>}, {pipeline_mode = #tpu.pipeline_mode<synchronous>, transform_indices = @transform_1, window_bounds = array<i64: 16, 128>}, {pipeline_mode = #tpu.pipeline_mode<synchronous>, transform_indices = @transform_2, window_bounds = array<i64: 1, 128>}, {pipeline_mode = #tpu.pipeline_mode<synchronous>, transform_indices = @transform_3, window_bounds = array<i64: 128, 128>}, {pipeline_mode = #tpu.pipeline_mode<synchronous>, transform_indices = @transform_4, window_bounds = array<i64: 1, 128>}, {pipeline_mode = #tpu.pipeline_mode<synchronous>, transform_indices = @transform_5, window_bounds = array<i64: 128, 4>}, {pipeline_mode = #tpu.pipeline_mode<synchronous>, transform_indices = @transform_6, window_bounds = array<i64: 1, 4>}, {transform_indices = @transform_7, window_bounds = array<i64: 72, 4>}]} {
    %c0 = arith.constant 0 : index
    %c0_0 = arith.constant 0 : index
    %0 = vector.load %arg1[%c0, %c0_0] : memref<72x16xf32, #tpu.memory_space<vmem>>, vector<72x16xf32>
    %1 = arith.truncf %0 : vector<72x16xf32> to vector<72x16xbf16>
    %c0_1 = arith.constant 0 : index
    %c0_2 = arith.constant 0 : index
    %2 = vector.load %arg2[%c0_1, %c0_2] : memref<16x128xbf16, #tpu.memory_space<vmem>>, vector<16x128xbf16>
    %cst = arith.constant dense<0.000000e+00> : vector<72x128xf32>
    %3 = tpu.matmul %1, %2, %cst {dimension_numbers = #tpu.dot_dimension_numbers<[1], [0], [0], [1], [0, 0, 1, 1], [], []>} : vector<72x16xbf16>, vector<16x128xbf16>, vector<72x128xf32> -> vector<72x128xf32>
    %c0_3 = arith.constant 0 : index
    %c0_4 = arith.constant 0 : index
    %4 = vector.load %arg3[%c0_3, %c0_4] : memref<1x128xf32, #tpu.memory_space<vmem>>, vector<1x128xf32>
    %5 = vector.broadcast %4 : vector<1x128xf32> to vector<72x128xf32>
    %6 = arith.addf %3, %5 : vector<72x128xf32>
    %cst_5 = arith.constant 0.000000e+00 : f32
    %7 = vector.broadcast %cst_5 : f32 to vector<72x128xf32>
    %8 = arith.maximumf %6, %7 : vector<72x128xf32>
    %9 = arith.truncf %8 : vector<72x128xf32> to vector<72x128xbf16>
    %c0_6 = arith.constant 0 : index
    %c0_7 = arith.constant 0 : index
    %10 = vector.load %arg4[%c0_6, %c0_7] : memref<128x128xbf16, #tpu.memory_space<vmem>>, vector<128x128xbf16>
    %cst_8 = arith.constant dense<0.000000e+00> : vector<72x128xf32>
    %11 = tpu.matmul %9, %10, %cst_8 {dimension_numbers = #tpu.dot_dimension_numbers<[1], [0], [0], [1], [0, 0, 1, 1], [], []>} : vector<72x128xbf16>, vector<128x128xbf16>, vector<72x128xf32> -> vector<72x128xf32>
    %c0_9 = arith.constant 0 : index
    %c0_10 = arith.constant 0 : index
    %12 = vector.load %arg5[%c0_9, %c0_10] : memref<1x128xf32, #tpu.memory_space<vmem>>, vector<1x128xf32>
    %13 = vector.broadcast %12 : vector<1x128xf32> to vector<72x128xf32>
    %14 = arith.addf %11, %13 : vector<72x128xf32>
    %cst_11 = arith.constant 0.000000e+00 : f32
    %15 = vector.broadcast %cst_11 : f32 to vector<72x128xf32>
    %16 = arith.maximumf %14, %15 : vector<72x128xf32>
    %17 = arith.truncf %16 : vector<72x128xf32> to vector<72x128xbf16>
    %c0_12 = arith.constant 0 : index
    %c0_13 = arith.constant 0 : index
    %18 = vector.load %arg6[%c0_12, %c0_13] : memref<128x4xbf16, #tpu.memory_space<vmem>>, vector<128x4xbf16>
    %cst_14 = arith.constant dense<0.000000e+00> : vector<72x4xf32>
    %19 = tpu.matmul %17, %18, %cst_14 {dimension_numbers = #tpu.dot_dimension_numbers<[1], [0], [0], [1], [0, 0, 1, 1], [], []>} : vector<72x128xbf16>, vector<128x4xbf16>, vector<72x4xf32> -> vector<72x4xf32>
    %c0_15 = arith.constant 0 : index
    %c0_16 = arith.constant 0 : index
    %20 = vector.load %arg7[%c0_15, %c0_16] : memref<1x4xf32, #tpu.memory_space<vmem>>, vector<1x4xf32>
    %21 = vector.broadcast %20 : vector<1x4xf32> to vector<72x4xf32>
    %22 = arith.addf %19, %21 : vector<72x4xf32>
    %c0_17 = arith.constant 0 : index
    %c0_18 = arith.constant 0 : index
    %23 = vector.load %arg8[%c0_17, %c0_18] : memref<72x4xf32, #tpu.memory_space<vmem>>, vector<72x4xf32>
    tpu.vector_store %arg8[%c0_17, %c0_18], %22 {strides = array<i32>} : memref<72x4xf32, #tpu.memory_space<vmem>>, vector<72x4xf32>,
    return
  }
  func.func @transform_0(%arg0: i32) -> (i32, i32) {
    %c0_i32 = arith.constant 0 : i32
    %c0_i32_0 = arith.constant 0 : i32
    return %arg0, %c0_i32 : i32, i32
  }
  func.func @transform_1(%arg0: i32) -> (i32, i32) {
    %c0_i32 = arith.constant 0 : i32
    %c0_i32_0 = arith.constant 0 : i32
    %c0_i32_1 = arith.constant 0 : i32
    return %c0_i32, %c0_i32_0 : i32, i32
  }
  func.func @transform_2(%arg0: i32) -> (i32, i32) {
    %c0_i32 = arith.constant 0 : i32
    %c0_i32_0 = arith.constant 0 : i32
    %c0_i32_1 = arith.constant 0 : i32
    return %c0_i32, %c0_i32_0 : i32, i32
  }
  func.func @transform_3(%arg0: i32) -> (i32, i32) {
    %c0_i32 = arith.constant 0 : i32
    %c0_i32_0 = arith.constant 0 : i32
    %c0_i32_1 = arith.constant 0 : i32
    return %c0_i32, %c0_i32_0 : i32, i32
  }
  func.func @transform_4(%arg0: i32) -> (i32, i32) {
    %c0_i32 = arith.constant 0 : i32
    %c0_i32_0 = arith.constant 0 : i32
    %c0_i32_1 = arith.constant 0 : i32
    return %c0_i32, %c0_i32_0 : i32, i32
  }
  func.func @transform_5(%arg0: i32) -> (i32, i32) {
    %c0_i32 = arith.constant 0 : i32
    %c0_i32_0 = arith.constant 0 : i32
    %c0_i32_1 = arith.constant 0 : i32
    return %c0_i32, %c0_i32_0 : i32, i32
  }
  func.func @transform_6(%arg0: i32) -> (i32, i32) {
    %c0_i32 = arith.constant 0 : i32
    %c0_i32_0 = arith.constant 0 : i32
    %c0_i32_1 = arith.constant 0 : i32
    return %c0_i32, %c0_i32_0 : i32, i32
  }
  func.func @transform_7(%arg0: i32) -> (i32, i32) {
    %c0_i32 = arith.constant 0 : i32
    %c0_i32_0 = arith.constant 0 : i32
    return %arg0, %c0_i32 : i32, i32
  }
}

</mosaic_0001>

<bundles_post_ra>
// kernel: _lambda_.1
= control target key start
LH: loop header
LB: loop body
LE: loop exit
PB: predicated region body
PF: predicated region fallthrough
CT: control target
= control target key end

     0   :  { %vm53_vm0 = vcmask 130048   ;;  %vm332_vm1 = vcmask 31744   ;;  %s623_s1 = inlined_call_operand.vmem [shape: bf16[16,128], index: 1, kind: input, shape index: {}]   ;;  %s624_s0 = inlined_call_operand.vmem [shape: f32[72,16], index: 0, kind: input, shape index: {}]   ;;  %s625_s2 = inlined_call_operand.vmem [shape: f32[1,128], index: 2, kind: input, shape index: {}]   ;;  %s626_s3 = inlined_call_operand.vmem [shape: bf16[128,128], index: 3, kind: input, shape index: {}]   ;;  %s627_s4 = inlined_call_operand.vmem [shape: f32[1,128], index: 4, kind: input, shape index: {}]   ;;  %s628_s5 = inlined_call_operand.vmem [shape: bf16[128,4], index: 5, kind: input, shape index: {}]   ;;  %s629_s6 = inlined_call_operand.vmem [shape: f32[1,4], index: 6, kind: input, shape index: {}]   ;;  %s630_s7 = inlined_call_operand.vmem [shape: f32[72,4], index: 7, kind: output, shape index: {}]  }
   0x1   :  { %v419_v0 = vld [vmem:[%s623_s1] sm:$0xff]  ;;  %v28_v2 = vld [vmem:[%s624_s0 + $0x8] sm:$0xff]  ;;  %v29_v4 = vld [vmem:[%s624_s0 + $0x10] sm:$0xff] }
   0x2   :  { %v27_v1 = vld [vmem:[%s624_s0] sm:$0xff]  ;;  %76 = vmatpush.bf16.msra.mxu0 %v419_v0  ;;  %v30_v5 = vld [vmem:[%s624_s0 + $0x18] sm:$0xff]  ;;  %v32_v8 = vld [vmem:[%s624_s0 + $0x28] sm:$0xff] }
   0x3   :  { %v36_v3 = vpack.c.bf16 %v28_v2, %v27_v1  ;;  %v37_v6 = vpack.c.bf16 %v30_v5, %v29_v4  ;;  %v31_v7 = vld [vmem:[%s624_s0 + $0x20] sm:$0xff]  ;;  %v427_v10 = vld [vmem:[%s626_s3 + $0x38] sm:$0xff]  ;;  %v426_v11 = vld [vmem:[%s626_s3 + $0x30] sm:$0xff] }
   0x4   :  { %v38_v9 = vpack.c.bf16 %v32_v8, %v31_v7  ;;  %184 = vmatpush.bf16.msra.mxu1 %v427_v10  ;;  %436 = vmatpush.bf16.msra.mxu3 %v427_v10  ;;  %v425_v12 = vld [vmem:[%s626_s3 + $0x28] sm:$0xff]  ;;  %v33_v13 = vld [vmem:[%s624_s0 + $0x30] sm:$0xff]  ;;  %v34_v14 = vld [vmem:[%s624_s0 + $0x38] sm:$0xff] }
   0x5   :  { %350 = vmatmul.msk.bf16.vlgmr.msra.gmra.mxu0 %vm53_vm0, %v36_v3  ;;  %v424_v15 = vld [vmem:[%s626_s3 + $0x20] sm:$0xff]  ;;  %v39_v16 = vpack.c.bf16 %v34_v14, %v33_v13  ;;  %v423_v19 = vld [vmem:[%s626_s3 + $0x18] sm:$0xff]  ;;  %v422_v20 = vld [vmem:[%s626_s3 + $0x10] sm:$0xff] }
   0x6   :  { %v35_v17 = vld [vmem:[%s624_s0 + $0x40] sm:$0xff]  ;;  %v421_v21 = vld [vmem:[%s626_s3 + $0x8] sm:$0xff]  ;;  %v435_v45 = vld [vmem:[%s628_s5 + $0x38] sm:$0xff] }
   0x7   :  { %v40_v18 = vpack.c.bf16 %v35_v17, %v35_v17  ;;  %v420_v22 = vld [vmem:[%s626_s3] sm:$0xff]  ;;  %v434_v47 = vld [vmem:[%s628_s5 + $0x30] sm:$0xff]  ;;  %444 = vmatpush.bf16.msra.mxu2 %v435_v45  ;;  %v433_v48 = vld [vmem:[%s628_s5 + $0x28] sm:$0xff] }
   0x8   :  { %185 = vmatpush.bf16.msra.mxu1 %v426_v11  ;;  %437 = vmatpush.bf16.msra.mxu3 %v426_v11  ;;  %v452_v24 = vld [vmem:[%s625_s2] ss:$0 sm:$0xff]  ;;  %v431_v61 = vld [vmem:[%s628_s5 + $0x18] sm:$0xff]  ;;  %v430_v62 = vld [vmem:[%s628_s5 + $0x10] sm:$0xff] }
   0x9   :  { %v432_v52 = vld [vmem:[%s628_s5 + $0x20] sm:$0xff]  ;;  %v429_v63 = vld [vmem:[%s628_s5 + $0x8] sm:$0xff] }
   0xa   :  { %v428_v0 = vld [vmem:[%s628_s5] sm:$0xff] }
   0xb   :  { %445 = vmatpush.bf16.msra.mxu2 %v434_v47  ;;  %v453_v2 = vld [vmem:[%s627_s4] ss:$0 sm:$0xff] }
   0xc   :  { %186 = vmatpush.bf16.msra.mxu1 %v425_v12  ;;  %438 = vmatpush.bf16.msra.mxu3 %v425_v12 }
   0xf   :  { %446 = vmatpush.bf16.msra.mxu2 %v433_v48 }
  0x10   :  { %187 = vmatpush.bf16.msra.mxu1 %v424_v15  ;;  %439 = vmatpush.bf16.msra.mxu3 %v424_v15 }
  0x13   :  { %447 = vmatpush.bf16.msra.mxu2 %v432_v52 }
  0x14   :  { %188 = vmatpush.bf16.msra.mxu1 %v423_v19  ;;  %440 = vmatpush.bf16.msra.mxu3 %v423_v19 }
  0x15   :  { %351 = vmatmul.msk.bf16.gmra.mxu0 %vm53_vm0, %v37_v6 }
  0x17   :  { %448 = vmatpush.bf16.msra.mxu2 %v431_v61 }
  0x18   :  { %189 = vmatpush.bf16.msra.mxu1 %v422_v20  ;;  %441 = vmatpush.bf16.msra.mxu3 %v422_v20 }
  0x1b   :  { %449 = vmatpush.bf16.msra.mxu2 %v430_v62 }
  0x1c   :  { %190 = vmatpush.bf16.msra.mxu1 %v421_v21  ;;  %442 = vmatpush.bf16.msra.mxu3 %v421_v21 }
  0x1f   :  { %450 = vmatpush.bf16.msra.mxu2 %v429_v63 }
  0x20   :  { %191 = vmatpush.bf16.msra.mxu1 %v420_v22  ;;  %443 = vmatpush.bf16.msra.mxu3 %v420_v22 }
  0x23   :  { %451 = vmatpush.bf16.msra.mxu2 %v428_v0 }
  0x24   :  { %299 = vmatpush.bf16.msrb.mxu1 %v435_v45 }
  0x25   :  { %352 = vmatmul.msk.bf16.gmra.mxu0 %vm53_vm0, %v38_v9 }
  0x28   :  { %300 = vmatpush.bf16.msrb.mxu1 %v434_v47 }
  0x2c   :  { %301 = vmatpush.bf16.msrb.mxu1 %v433_v48 }
  0x30   :  { %302 = vmatpush.bf16.msrb.mxu1 %v432_v52 }
  0x34   :  { %303 = vmatpush.bf16.msrb.mxu1 %v431_v61 }
  0x35   :  { %353 = vmatmul.msk.bf16.gmra.mxu0 %vm53_vm0, %v39_v16 }
  0x38   :  { %304 = vmatpush.bf16.msrb.mxu1 %v430_v62 }
  0x3c   :  { %305 = vmatpush.bf16.msrb.mxu1 %v429_v63 }
  0x40   :  { %306 = vmatpush.bf16.msrb.mxu1 %v428_v0 }
  0x45   :  { %354 = vmatmul.msk.bf16.gmra.mxu0 %vm53_vm0, %v40_v18 }
  0x82   :  { %v78_v23 = vpop.f32.mrf.mxu0 }
  0x83   :  { %v79_v25 = vadd.f32 %v452_v24, %v78_v23 }
  0x85   :  { %v102_v28 = vmax.f32 %v79_v25, 0.0 }
  0x8a   :  { %v80_v26 = vpop.f32.mrf.mxu0 }
  0x8b   :  { %v81_v27 = vadd.f32 %v452_v24, %v80_v26 }
  0x8d   :  { %v103_v29 = vmax.f32 %v81_v27, 0.0 }
  0x8f   :  { %v111_v30 = vpack.c.bf16 %v103_v29, %v102_v28 }
  0x91   :  { %192 = vmatmul.bf16.vlgmr.msra.gmra.mxu1 %v111_v30 }
  0x92   :  { %v83_v31 = vpop.f32.mrf.mxu0 }
  0x93   :  { %v84_v32 = vadd.f32 %v452_v24, %v83_v31 }
  0x95   :  { %v104_v35 = vmax.f32 %v84_v32, 0.0 }
  0x9a   :  { %v85_v33 = vpop.f32.mrf.mxu0 }
  0x9b   :  { %v86_v34 = vadd.f32 %v452_v24, %v85_v33 }
  0x9d   :  { %v105_v36 = vmax.f32 %v86_v34, 0.0 }
  0x9f   :  { %v112_v37 = vpack.c.bf16 %v105_v36, %v104_v35  ;;  %v454_v35 = vld [vmem:[%s629_s6] ss:$0 sm:$0xff] }
  0xa1   :  { %197 = vmatmul.bf16.vlgmr.msra.gmra.mxu3 %v112_v37 }
  0xa2   :  { %v88_v38 = vpop.f32.mrf.mxu0 }
  0xa3   :  { %v89_v39 = vadd.f32 %v452_v24, %v88_v38 }
  0xa5   :  { %v106_v42 = vmax.f32 %v89_v39, 0.0 }
  0xaa   :  { %v90_v40 = vpop.f32.mrf.mxu0 }
  0xab   :  { %v91_v41 = vadd.f32 %v452_v24, %v90_v40 }
  0xad   :  { %v107_v43 = vmax.f32 %v91_v41, 0.0 }
  0xaf   :  { %v113_v44 = vpack.c.bf16 %v107_v43, %v106_v42 }
  0xb1   :  { %202 = vmatmul.bf16.gmra.mxu3 %v113_v44 }
  0xb2   :  { %v93_v46 = vpop.f32.mrf.mxu0 }
  0xb3   :  { %v94_v49 = vadd.f32 %v452_v24, %v93_v46 }
  0xb5   :  { %v108_v53 = vmax.f32 %v94_v49, 0.0 }
  0xba   :  { %v95_v50 = vpop.f32.mrf.mxu0 }
  0xbb   :  { %v96_v51 = vadd.f32 %v452_v24, %v95_v50 }
  0xbd   :  { %v109_v54 = vmax.f32 %v96_v51, 0.0 }
  0xbf   :  { %v114_v55 = vpack.c.bf16 %v109_v54, %v108_v53 }
  0xc1   :  { %207 = vmatmul.bf16.gmra.mxu3 %v114_v55 }
  0xc2   :  { %v98_v56 = vpop.f32.mrf.mxu0 }
  0xc3   :  { %v99_v57 = vadd.f32 %v452_v24, %v98_v56 }
  0xc5   :  { %v110_v58 = vmax.f32 %v99_v57, 0.0 }
  0xc7   :  { %v115_v60 = vpack.c.bf16 %v110_v58, %v110_v58 }
  0xca   :  { %v100_v59 = vpop.f32.mrf.mxu0 }
  0xd1   :  { %212 = vmatmul.bf16.gmra.mxu3 %v115_v60 }
 0x10e   :  { %v193_v1 = vpop.f32.mrf.mxu1 }
 0x10f   :  { %v194_v3 = vadd.f32 %v453_v2, %v193_v1 }
 0x111   :  { %v217_v6 = vmax.f32 %v194_v3, 0.0 }
 0x116   :  { %v195_v4 = vpop.f32.mrf.mxu1 }
 0x117   :  { %v196_v5 = vadd.f32 %v453_v2, %v195_v4 }
 0x119   :  { %v218_v7 = vmax.f32 %v196_v5, 0.0 }
 0x11b   :  { %v226_v8 = vpack.c.bf16 %v218_v7, %v217_v6 }
 0x11d   :  { %307 = vmatmul.bf16.vlgmr.msrb.gmra.mxu1 %v226_v8 }
 0x124   :  { %v198_v9 = vpop.f32.mrf.mxu3 }
 0x125   :  { %v199_v10 = vadd.f32 %v453_v2, %v198_v9 }
 0x127   :  { %v219_v13 = vmax.f32 %v199_v10, 0.0 }
 0x12c   :  { %v200_v11 = vpop.f32.mrf.mxu3 }
 0x12d   :  { %v201_v12 = vadd.f32 %v453_v2, %v200_v11 }
 0x12f   :  { %v220_v14 = vmax.f32 %v201_v12, 0.0 }
 0x131   :  { %v227_v15 = vpack.c.bf16 %v220_v14, %v219_v13 }
 0x133   :  { %312 = vmatmul.bf16.vlgmr.msra.gmra.mxu2 %v227_v15 }
 0x134   :  { %v203_v16 = vpop.f32.mrf.mxu3 }
 0x135   :  { %v204_v17 = vadd.f32 %v453_v2, %v203_v16 }
 0x137   :  { %v221_v20 = vmax.f32 %v204_v17, 0.0 }
 0x13c   :  { %v205_v18 = vpop.f32.mrf.mxu3 }
 0x13d   :  { %v206_v19 = vadd.f32 %v453_v2, %v205_v18 }
 0x13f   :  { %v222_v21 = vmax.f32 %v206_v19, 0.0 }
 0x141   :  { %v228_v22 = vpack.c.bf16 %v222_v21, %v221_v20 }
 0x143   :  { %317 = vmatmul.bf16.gmra.mxu2 %v228_v22 }
 0x144   :  { %v208_v23 = vpop.f32.mrf.mxu3 }
 0x145   :  { %v209_v24 = vadd.f32 %v453_v2, %v208_v23 }
 0x147   :  { %v223_v27 = vmax.f32 %v209_v24, 0.0 }
 0x14c   :  { %v210_v25 = vpop.f32.mrf.mxu3 }
 0x14d   :  { %v211_v26 = vadd.f32 %v453_v2, %v210_v25 }
 0x14f   :  { %v224_v28 = vmax.f32 %v211_v26, 0.0 }
 0x151   :  { %v229_v29 = vpack.c.bf16 %v224_v28, %v223_v27 }
 0x153   :  { %322 = vmatmul.bf16.gmra.mxu2 %v229_v29 }
 0x154   :  { %v213_v30 = vpop.f32.mrf.mxu3 }
 0x155   :  { %v214_v31 = vadd.f32 %v453_v2, %v213_v30 }
 0x157   :  { %v225_v32 = vmax.f32 %v214_v31, 0.0 }
 0x159   :  { %v230_v34 = vpack.c.bf16 %v225_v32, %v225_v32 }
 0x15c   :  { %v215_v33 = vpop.f32.mrf.mxu3 }
 0x163   :  { %327 = vmatmul.bf16.gmra.mxu2 %v230_v34 }
 0x19a   :  { %v308_v36 = vpop.f32.mrf.mxu1 }
 0x19b   :  { %v309_v37 = vadd.f32 %v454_v35, %v308_v36 }
 0x19d   :  { %333 = vst.msk [vmem:[%s630_s7] sm:$0xff] %vm332_vm1, %v309_v37 }
 0x1a2   :  { %v310_v38 = vpop.f32.mrf.mxu1 }
 0x1a3   :  { %v311_v39 = vadd.f32 %v454_v35, %v310_v38 }
 0x1a5   :  { %334 = vst.msk [vmem:[%s630_s7 + $0x8] sm:$0xff] %vm332_vm1, %v311_v39 }
 0x1b6   :  { %v313_v40 = vpop.f32.mrf.mxu2 }
 0x1b7   :  { %v314_v41 = vadd.f32 %v454_v35, %v313_v40 }
 0x1b9   :  { %335 = vst.msk [vmem:[%s630_s7 + $0x10] sm:$0xff] %vm332_vm1, %v314_v41 }
 0x1be   :  { %v315_v42 = vpop.f32.mrf.mxu2 }
 0x1bf   :  { %v316_v43 = vadd.f32 %v454_v35, %v315_v42 }
 0x1c1   :  { %336 = vst.msk [vmem:[%s630_s7 + $0x18] sm:$0xff] %vm332_vm1, %v316_v43 }
 0x1c6   :  { %v318_v44 = vpop.f32.mrf.mxu2 }
 0x1c7   :  { %v319_v45 = vadd.f32 %v454_v35, %v318_v44 }
 0x1c9   :  { %337 = vst.msk [vmem:[%s630_s7 + $0x20] sm:$0xff] %vm332_vm1, %v319_v45 }
 0x1ce   :  { %v320_v46 = vpop.f32.mrf.mxu2 }
 0x1cf   :  { %v321_v47 = vadd.f32 %v454_v35, %v320_v46 }
 0x1d1   :  { %338 = vst.msk [vmem:[%s630_s7 + $0x28] sm:$0xff] %vm332_vm1, %v321_v47 }
 0x1d6   :  { %v323_v48 = vpop.f32.mrf.mxu2 }
 0x1d7   :  { %v324_v49 = vadd.f32 %v454_v35, %v323_v48 }
 0x1d9   :  { %339 = vst.msk [vmem:[%s630_s7 + $0x30] sm:$0xff] %vm332_vm1, %v324_v49 }
 0x1de   :  { %v325_v50 = vpop.f32.mrf.mxu2 }
 0x1df   :  { %v326_v51 = vadd.f32 %v454_v35, %v325_v50 }
 0x1e1   :  { %340 = vst.msk [vmem:[%s630_s7 + $0x38] sm:$0xff] %vm332_vm1, %v326_v51 }
 0x1e6   :  { %v328_v52 = vpop.f32.mrf.mxu2 }
 0x1e7   :  { %v329_v53 = vadd.f32 %v454_v35, %v328_v52 }
 0x1e9   :  { %341 = vst.msk [vmem:[%s630_s7 + $0x40] sm:$0xff] %vm332_vm1, %v329_v53 }
 0x1ee   :  { %v330_v54 = vpop.f32.mrf.mxu2 }

</bundles_post_ra>
